<compile_context>
chip_gen: v6e
topology: v6e:2x2x1
jax: 0.10.0
libtpu: 0.0.40
codegen_flags: <defaults>
</compile_context>

<pallas_src>
import functools

import jax
import jax.numpy as jnp
from jax.experimental import pallas as pl
from jax.experimental.pallas import tpu as pltpu


def _margin_logloss_kernel(logit_ref, target_ref, params_ref, ploss_ref,
                           *, ignore_index, hw, chunk):
    j = pl.program_id(1)
    C, T = logit_ref.shape            # classes on sublanes, pixels on lanes
    n_chunks = T // chunk

    # (C, 1) per-class columns, hoisted out of the chunk loop.
    m_pos = params_ref[:, 0:1]        # margin at the target class
    m_neg = params_ref[:, 1:2]        # margin (already negated) elsewhere
    lin_pos = params_ref[:, 2:3]      # (1 - y) coefficient, target class
    lin_neg = params_ref[:, 3:4]      # (1 - y) coefficient, non-target
    sp_pos = params_ref[:, 4:5]       # 1 + (pos_weight - 1) * y, target class
    sp_neg = params_ref[:, 5:6]       # 1 + (pos_weight - 1) * y, non-target
    cls_col = jax.lax.broadcasted_iota(jnp.int32, (C, 1), 0)
    lane_in_chunk = jax.lax.broadcasted_iota(jnp.int32, (1, chunk), 1)
    tile_base = j * T

    def body(g, acc):
        off = pl.multiple_of(g * chunk, chunk)
        x = logit_ref[:, pl.ds(off, chunk)]           # (C, chunk), input dtype
        tgt = target_ref[:, pl.ds(off, chunk)]        # (1, chunk) int32

        # --- top-2 along the class (sublane) axis; ties match torch.topk ---
        m1 = jnp.max(x, axis=0, keepdims=True)
        is_max = x == m1
        num_max = jnp.sum(is_max.astype(jnp.int32), axis=0, keepdims=True)
        m2 = jnp.max(jnp.where(is_max, jnp.asarray(-jnp.inf, x.dtype), x),
                     axis=0, keepdims=True)
        # Runner-up at the (unique) argmax class, best score elsewhere; on a
        # tie torch's second topk value equals the max, so keep m1 everywhere.
        sub_max = jnp.where(is_max & (num_max == 1), m2, m1)
        # bf16 inputs stay bf16 through the (exact) ordering stage above.
        # TODO(synk): on v5e (no bf16 VPU) feed f32 logits to avoid converts.
        score = (x - sub_max).astype(jnp.float32)

        is_target = cls_col == tgt                    # (C, chunk) bool
        z = score - jnp.where(is_target, m_pos, m_neg)
        # Stable softplus(-z); per-class BCE coefficients are precomputed.
        softplus_neg = jnp.maximum(-z, 0.0) + jnp.log1p(jnp.exp(-jnp.abs(z)))
        loss = (jnp.where(is_target, lin_pos, lin_neg) * z
                + jnp.where(is_target, sp_pos, sp_neg) * softplus_neg)

        # Class reduction first, then select-mask the (1, chunk) row: OOB tail
        # lanes / ignore_index pixels contribute exactly 0 (select, not mul,
        # so NaN/Inf from garbage logits in the partial last block never leak).
        loss_row = jnp.sum(loss, axis=0, keepdims=True)
        lane = tile_base + off + lane_in_chunk
        valid = (lane < hw) & (tgt != ignore_index)
        loss_row = jnp.where(valid, loss_row, 0.0)

        # Fold the chunk down to a lane-dense (1, 128) partial and accumulate.
        part = loss_row[:, 0:128]
        for k in range(1, chunk // 128):
            part = part + loss_row[:, k * 128:(k + 1) * 128]
        return acc + part

    acc = jax.lax.fori_loop(0, n_chunks, body,
                            jnp.zeros((1, 128), jnp.float32),
                            unroll=min(4, n_chunks))
    ploss_ref[...] = acc


def margin_logloss(logit, target, margins, ignore_index=255, tile_hw=16384):
    n, c, h, w = logit.shape
    hw = h * w
    x = logit.reshape(n, c, hw)                       # free view (NCHW contiguous)
    t = target.reshape(n, 1, hw).astype(jnp.int32)

    # Lane dim must be a multiple of 128 (or the full extent); pad the rare
    # odd case (padded pixels carry ignore_index and are masked in-kernel).
    if hw % 128 != 0:
        pad = (-hw) % 128
        x = jnp.pad(x, ((0, 0), (0, 0), (0, pad)))
        t = jnp.pad(t, ((0, 0), (0, 0), (0, pad)), constant_values=ignore_index)
    hw_p = x.shape[2]

    # --- pixel tile: as large as possible, bounded by a conservative VMEM
    # budget (fits the v5e 16 MiB scoped default with double buffering). ---
    tile_hw = max(128, min((int(tile_hw) // 128) * 128, hw_p))
    bytes_per_pixel = 2 * c * x.dtype.itemsize + 2 * 4   # dbl-buffered logits + target
    max_by_vmem = max(128, ((12 * 1024 * 1024) // max(bytes_per_pixel, 1) // 128) * 128)
    tile_hw = min(tile_hw, max_by_vmem)
    # v7x has 2 TensorCores: keep >= 2 grid steps when batch == 1.
    if n == 1 and tile_hw >= hw_p and hw_p >= 256:
        tile_hw = max(128, ((hw_p // 2) // 128) * 128)
    num_j = pl.cdiv(hw_p, tile_hw)
    total_tiles = n * num_j
    chunk = 256 if tile_hw % 256 == 0 else 128

    # Per-class constants hoisted out of the per-element path (pos_weight = c).
    margins_arr = jnp.asarray(margins, jnp.float32)       # (2, c)
    pos_m = margins_arr[0]
    neg_m = margins_arr[1]
    pw = jnp.float32(c)
    y_pos = (pos_m > 0).astype(jnp.float32)
    y_neg = ((-neg_m) > 0).astype(jnp.float32)
    params = jnp.stack([
        pos_m, -neg_m,
        1.0 - y_pos, 1.0 - y_neg,
        1.0 + (pw - 1.0) * y_pos, 1.0 + (pw - 1.0) * y_neg,
        jnp.zeros_like(pos_m), jnp.zeros_like(pos_m),
    ], axis=1)                                            # (c, 8) f32

    kernel = functools.partial(_margin_logloss_kernel,
                               ignore_index=ignore_index, hw=hw_p, chunk=chunk)

    ploss = pl.pallas_call(
        kernel,
        out_shape=jax.ShapeDtypeStruct((1, total_tiles * 128), jnp.float32),
        grid_spec=pltpu.PrefetchScalarGridSpec(
            num_scalar_prefetch=0,
            grid=(n, num_j),
            in_specs=[
                pl.BlockSpec((None, c, tile_hw), lambda b, j: (b, 0, j)),  # logits tile
                pl.BlockSpec((None, 1, tile_hw), lambda b, j: (b, 0, j)),  # target tile
                pl.BlockSpec((c, 8), lambda b, j: (0, 0)),                 # per-class params
            ],
            out_specs=pl.BlockSpec((1, 128), lambda b, j: (0, b * num_j + j)),
        ),
        compiler_params=pltpu.CompilerParams(
            dimension_semantics=("parallel", "parallel")),
    )(x, t, params)

    loss_sum = jnp.sum(ploss)
    cnt = jnp.sum(target != ignore_index).astype(jnp.float32)
    # TODO(synk): cnt == 0 (every pixel ignored) yields NaN, matching the
    # PyTorch reference's mean over an empty selection.
    return loss_sum / (cnt * pw)


def _reference_loss(logit, target, margins, ignore_index=255):
    """Pure-JAX reference matching the PyTorch forward (eager, dynamic filter)."""
    n, c, h, w = logit.shape
    x = jnp.moveaxis(logit, 1, -1).reshape(-1, c).astype(jnp.float32)
    t = target.reshape(-1)
    keep = t != ignore_index
    xv = x[keep]
    tv = t[keep]
    cls = jnp.arange(c)
    m1 = xv.max(axis=1, keepdims=True)
    a = jnp.argmax(xv, axis=1)
    oh = a[:, None] == cls[None, :]
    m2 = jnp.where(oh, -jnp.inf, xv).max(axis=1, keepdims=True)
    sub = jnp.where(oh, m2, m1)
    score = xv - sub
    marg = jnp.where(tv[:, None] == cls[None, :],
                     margins[0][None, :], -margins[1][None, :])
    z = score - marg
    y = (marg > 0).astype(jnp.float32)
    pw = float(c)
    sp = jnp.maximum(-z, 0.0) + jnp.log1p(jnp.exp(-jnp.abs(z)))
    loss = (1.0 - y) * z + (1.0 + (pw - 1.0) * y) * sp
    return loss.mean()


if __name__ == "__main__":
    key = jax.random.PRNGKey(0)
    k1, k2, k3 = jax.random.split(key, 3)

    ignore_index = 255
    n, c = 2, 4

    # margins buffer: row 0 = positive per-class margins, row 1 = negative.
    margins = jnp.stack([
        jnp.array([0.5, 0.4, 0.3, 0.2], dtype=jnp.float32),
        jnp.full((c,), 0.1, dtype=jnp.float32),
    ], axis=0)

    # --- primary test: (2, 4, 16, 16), default large tile (clamped to H*W) ---
    h, w = 16, 16
    logit = jax.random.normal(k1, (n, c, h, w), dtype=jnp.float32)
    target = jax.random.randint(k2, (n, h, w), 0, c, dtype=jnp.int32)
    ignore_mask = jax.random.bernoulli(k3, 0.1, (n, h, w))
    target = jnp.where(ignore_mask, ignore_index, target)

    out = jax.block_until_ready(
        margin_logloss(logit, target, margins, ignore_index=ignore_index))
    ref = _reference_loss(logit, target, margins, ignore_index=ignore_index)
    assert jnp.allclose(out, ref, rtol=1e-4, atol=1e-5), (out, ref)

    # --- multi-tile test: exercises per-tile partial outputs (num_j > 1) ---
    out2 = jax.block_until_ready(
        margin_logloss(logit, target, margins, ignore_index=ignore_index,
                       tile_hw=128))
    assert jnp.allclose(out2, ref, rtol=1e-4, atol=1e-5), (out2, ref)

    # --- ragged-tail test: H*W = 384, tile 256 -> last block partially OOB ---
    h3, w3 = 16, 24
    k4, k5, k6 = jax.random.split(jax.random.PRNGKey(1), 3)
    logit3 = jax.random.normal(k4, (n, c, h3, w3), dtype=jnp.float32)
    target3 = jax.random.randint(k5, (n, h3, w3), 0, c, dtype=jnp.int32)
    target3 = jnp.where(jax.random.bernoulli(k6, 0.1, (n, h3, w3)),
                        ignore_index, target3)
    out3 = jax.block_until_ready(
        margin_logloss(logit3, target3, margins, ignore_index=ignore_index,
                       tile_hw=256))
    ref3 = _reference_loss(logit3, target3, margins, ignore_index=ignore_index)
    assert jnp.allclose(out3, ref3, rtol=1e-4, atol=1e-5), (out3, ref3)

    print("KERNEL_OK")
</pallas_src>

<mosaic_0001>
module attributes {stable_mosaic.version = 11 : i64} {
  func.func @_margin_logloss_kernel(%arg0: i32, %arg1: i32, %arg2: memref<1x4x256xf32, #tpu.memory_space<vmem>>, %arg3: memref<1x1x256xi32, #tpu.memory_space<vmem>>, %arg4: memref<4x8xf32, #tpu.memory_space<vmem>>, %arg5: memref<1x128xf32, #tpu.memory_space<vmem>>) attributes {dimension_semantics = [#tpu.dimension_semantics<parallel>, #tpu.dimension_semantics<parallel>], iteration_bounds = array<i64: 2, 1>, scalar_prefetch = 0 : i64, scratch_operands = 0 : i64, tpu.core_type = #tpu.core_type<tc>, window_params = [{transform_indices = @transform_0, window_bounds = array<i64: 1, 4, 256>}, {transform_indices = @transform_1, window_bounds = array<i64: 1, 1, 256>}, {pipeline_mode = #tpu.pipeline_mode<synchronous>, transform_indices = @transform_2, window_bounds = array<i64: 4, 8>}, {transform_indices = @transform_3, window_bounds = array<i64: 1, 128>}]} {
    %c0 = arith.constant 0 : index
    %c0_0 = arith.constant 0 : index
    %0 = vector.load %arg4[%c0, %c0_0] : memref<4x8xf32, #tpu.memory_space<vmem>>, vector<4x1xf32>
    %c0_1 = arith.constant 0 : index
    %c1 = arith.constant 1 : index
    %1 = vector.load %arg4[%c0_1, %c1] : memref<4x8xf32, #tpu.memory_space<vmem>>, vector<4x1xf32>
    %c0_2 = arith.constant 0 : index
    %c2 = arith.constant 2 : index
    %2 = vector.load %arg4[%c0_2, %c2] : memref<4x8xf32, #tpu.memory_space<vmem>>, vector<4x1xf32>
    %c0_3 = arith.constant 0 : index
    %c3 = arith.constant 3 : index
    %3 = vector.load %arg4[%c0_3, %c3] : memref<4x8xf32, #tpu.memory_space<vmem>>, vector<4x1xf32>
    %c0_4 = arith.constant 0 : index
    %c4 = arith.constant 4 : index
    %4 = vector.load %arg4[%c0_4, %c4] : memref<4x8xf32, #tpu.memory_space<vmem>>, vector<4x1xf32>
    %c0_5 = arith.constant 0 : index
    %c5 = arith.constant 5 : index
    %5 = vector.load %arg4[%c0_5, %c5] : memref<4x8xf32, #tpu.memory_space<vmem>>, vector<4x1xf32>
    %6 = tpu.iota {dimensions = array<i32: 0>} : vector<4x1xi32>
    %7 = tpu.iota {dimensions = array<i32: 1>} : vector<1x256xi32>
    %c256_i32 = arith.constant 256 : i32
    %8 = arith.muli %arg1, %c256_i32 : i32
    %cst = arith.constant 0.000000e+00 : f32
    %9 = vector.broadcast %cst : f32 to vector<1x128xf32>
    %c0_i32 = arith.constant 0 : i32
    %c256_i32_6 = arith.constant 256 : i32
    %10 = arith.muli %c0_i32, %c256_i32_6 : i32
    %11 = tpu.assume_multiple %10, 256 : i32
    %c0_7 = arith.constant 0 : index
    %c0_8 = arith.constant 0 : index
    %12 = arith.index_cast %11 : i32 to index
    %13 = vector.load %arg2[%c0_7, %c0_8, %12] : memref<1x4x256xf32, #tpu.memory_space<vmem>>, vector<1x4x256xf32>
    %14 = vector.shape_cast %13 : vector<1x4x256xf32> to vector<4x256xf32>
    %c0_9 = arith.constant 0 : index
    %c0_10 = arith.constant 0 : index
    %15 = arith.index_cast %11 : i32 to index
    %16 = vector.load %arg3[%c0_9, %c0_10, %15] : memref<1x1x256xi32, #tpu.memory_space<vmem>>, vector<1x1x256xi32>
    %17 = vector.shape_cast %16 : vector<1x1x256xi32> to vector<1x256xi32>
    %cst_11 = arith.constant dense<0xFF800000> : vector<256xf32>
    %18 = vector.multi_reduction <maximumf>, %14, %cst_11 [0] : vector<4x256xf32> to vector<256xf32>
    %19 = vector.shape_cast %18 : vector<256xf32> to vector<1x256xf32>
    %20 = vector.broadcast %19 : vector<1x256xf32> to vector<4x256xf32>
    %21 = arith.cmpf oeq, %14, %20 : vector<4x256xf32>
    %22 = arith.extui %21 : vector<4x256xi1> to vector<4x256xi32>
    %cst_12 = arith.constant dense<0> : vector<256xi32>
    %23 = vector.multi_reduction <add>, %22, %cst_12 [0] : vector<4x256xi32> to vector<256xi32>
    %24 = vector.shape_cast %23 : vector<256xi32> to vector<1x256xi32>
    %cst_13 = arith.constant 0xFF800000 : f32
    %25 = vector.broadcast %cst_13 : f32 to vector<4x256xf32>
    %26 = arith.select %21, %25, %14 : vector<4x256xi1>, vector<4x256xf32>
    %cst_14 = arith.constant dense<0xFF800000> : vector<256xf32>
    %27 = vector.multi_reduction <maximumf>, %26, %cst_14 [0] : vector<4x256xf32> to vector<256xf32>
    %28 = vector.shape_cast %27 : vector<256xf32> to vector<1x256xf32>
    %c1_i32 = arith.constant 1 : i32
    %29 = vector.broadcast %c1_i32 : i32 to vector<1x256xi32>
    %30 = arith.cmpi eq, %24, %29 : vector<1x256xi32>
    %31 = vector.broadcast %30 : vector<1x256xi1> to vector<4x256xi1>
    %32 = arith.andi %21, %31 : vector<4x256xi1>
    %33 = vector.shape_cast %28 : vector<1x256xf32> to vector<1x256xf32>
    %34 = vector.broadcast %33 : vector<1x256xf32> to vector<4x256xf32>
    %35 = vector.shape_cast %19 : vector<1x256xf32> to vector<1x256xf32>
    %36 = vector.broadcast %35 : vector<1x256xf32> to vector<4x256xf32>
    %37 = arith.select %32, %34, %36 : vector<4x256xi1>, vector<4x256xf32>
    %38 = arith.subf %14, %37 : vector<4x256xf32>
    %39 = vector.broadcast %6 : vector<4x1xi32> to vector<4x256xi32>
    %40 = vector.broadcast %17 : vector<1x256xi32> to vector<4x256xi32>
    %41 = arith.cmpi eq, %39, %40 : vector<4x256xi32>
    %42 = vector.shape_cast %0 : vector<4x1xf32> to vector<4x1xf32>
    %43 = vector.broadcast %42 : vector<4x1xf32> to vector<4x256xf32>
    %44 = vector.shape_cast %1 : vector<4x1xf32> to vector<4x1xf32>
    %45 = vector.broadcast %44 : vector<4x1xf32> to vector<4x256xf32>
    %46 = arith.select %41, %43, %45 : vector<4x256xi1>, vector<4x256xf32>
    %47 = arith.subf %38, %46 : vector<4x256xf32>
    %cst_15 = arith.constant 0.000000e+00 : f32
    %48 = vector.broadcast %cst_15 : f32 to vector<4x256xf32>
    %49 = arith.subf %48, %47 : vector<4x256xf32>
    %cst_16 = arith.constant 0.000000e+00 : f32
    %50 = vector.broadcast %cst_16 : f32 to vector<4x256xf32>
    %51 = arith.maximumf %49, %50 : vector<4x256xf32>
    %52 = math.absf %47 : vector<4x256xf32>
    %cst_17 = arith.constant 0.000000e+00 : f32
    %53 = vector.broadcast %cst_17 : f32 to vector<4x256xf32>
    %54 = arith.subf %53, %52 : vector<4x256xf32>
    %55 = math.exp %54 : vector<4x256xf32>
    %56 = math.log1p %55 : vector<4x256xf32>
    %57 = arith.addf %51, %56 : vector<4x256xf32>
    %58 = vector.shape_cast %2 : vector<4x1xf32> to vector<4x1xf32>
    %59 = vector.broadcast %58 : vector<4x1xf32> to vector<4x256xf32>
    %60 = vector.shape_cast %3 : vector<4x1xf32> to vector<4x1xf32>
    %61 = vector.broadcast %60 : vector<4x1xf32> to vector<4x256xf32>
    %62 = arith.select %41, %59, %61 : vector<4x256xi1>, vector<4x256xf32>
    %63 = arith.mulf %62, %47 : vector<4x256xf32>
    %64 = vector.shape_cast %4 : vector<4x1xf32> to vector<4x1xf32>
    %65 = vector.broadcast %64 : vector<4x1xf32> to vector<4x256xf32>
    %66 = vector.shape_cast %5 : vector<4x1xf32> to vector<4x1xf32>
    %67 = vector.broadcast %66 : vector<4x1xf32> to vector<4x256xf32>
    %68 = arith.select %41, %65, %67 : vector<4x256xi1>, vector<4x256xf32>
    %69 = arith.mulf %68, %57 : vector<4x256xf32>
    %70 = arith.addf %63, %69 : vector<4x256xf32>
    %cst_18 = arith.constant dense<0.000000e+00> : vector<256xf32>
    %71 = vector.multi_reduction <add>, %70, %cst_18 [0] : vector<4x256xf32> to vector<256xf32>
    %72 = vector.shape_cast %71 : vector<256xf32> to vector<1x256xf32>
    %73 = arith.addi %8, %11 : i32
    %74 = vector.broadcast %73 : i32 to vector<1x256xi32>
    %75 = arith.addi %74, %7 : vector<1x256xi32>
    %c256_i32_19 = arith.constant 256 : i32
    %76 = vector.broadcast %c256_i32_19 : i32 to vector<1x256xi32>
    %77 = arith.cmpi slt, %75, %76 : vector<1x256xi32>
    %c255_i32 = arith.constant 255 : i32
    %78 = vector.broadcast %c255_i32 : i32 to vector<1x256xi32>
    %79 = arith.cmpi ne, %17, %78 : vector<1x256xi32>
    %80 = arith.andi %77, %79 : vector<1x256xi1>
    %cst_20 = arith.constant 0.000000e+00 : f32
    %81 = vector.broadcast %cst_20 : f32 to vector<1x256xf32>
    %82 = arith.select %80, %72, %81 : vector<1x256xi1>, vector<1x256xf32>
    %83 = vector.extract_strided_slice %82 {offsets = [0, 0], sizes = [1, 128], strides = [1, 1]} : vector<1x256xf32> to vector<1x128xf32>
    %84 = vector.extract_strided_slice %82 {offsets = [0, 128], sizes = [1, 128], strides = [1, 1]} : vector<1x256xf32> to vector<1x128xf32>
    %85 = arith.addf %83, %84 : vector<1x128xf32>
    %86 = arith.addf %9, %85 : vector<1x128xf32>
    %c1_i32_21 = arith.constant 1 : i32
    %c0_22 = arith.constant 0 : index
    %c0_23 = arith.constant 0 : index
    %87 = vector.load %arg5[%c0_22, %c0_23] : memref<1x128xf32, #tpu.memory_space<vmem>>, vector<1x128xf32>
    tpu.vector_store %arg5[%c0_22, %c0_23], %86 {strides = array<i32>} : memref<1x128xf32, #tpu.memory_space<vmem>>, vector<1x128xf32>,
    return
  }
  func.func @transform_0(%arg0: i32, %arg1: i32) -> (i32, i32, i32) {
    %c0_i32 = arith.constant 0 : i32
    %c0_i32_0 = arith.constant 0 : i32
    return %arg0, %c0_i32, %arg1 : i32, i32, i32
  }
  func.func @transform_1(%arg0: i32, %arg1: i32) -> (i32, i32, i32) {
    %c0_i32 = arith.constant 0 : i32
    %c0_i32_0 = arith.constant 0 : i32
    return %arg0, %c0_i32, %arg1 : i32, i32, i32
  }
  func.func @transform_2(%arg0: i32, %arg1: i32) -> (i32, i32) {
    %c0_i32 = arith.constant 0 : i32
    %c0_i32_0 = arith.constant 0 : i32
    %c0_i32_1 = arith.constant 0 : i32
    return %c0_i32, %c0_i32_0 : i32, i32
  }
  func.func @transform_3(%arg0: i32, %arg1: i32) -> (i32, i32) {
    %c1_i32 = arith.constant 1 : i32
    %0 = arith.muli %arg0, %c1_i32 : i32
    %1 = arith.addi %0, %arg1 : i32
    %c0_i32 = arith.constant 0 : i32
    %c0_i32_0 = arith.constant 0 : i32
    return %c0_i32, %1 : i32, i32
  }
}

</mosaic_0001>

<bundles_post_ra>
// kernel: tpu_custom_call.1
= control target key start
LH: loop header
LB: loop body
LE: loop exit
PB: predicated region body
PF: predicated region fallthrough
CT: control target
= control target key end

     0   :  { %s1170_s0 = inlined_call_operand.hbm [shape: f32[2,4,256], index: 0, kind: input, shape index: {}]   ;;  %s1171_s1 = inlined_call_operand.hbm [shape: s32[2,1,256], index: 1, kind: input, shape index: {}]   ;;  %s1172_s2 = inlined_call_operand.hbm [shape: f32[4,8], index: 2, kind: input, shape index: {}]   ;;  %s1173_s3 = inlined_call_operand.hbm [shape: f32[1,256], index: 3, kind: output, shape index: {}]  }
   0x1   :  { %1179 = sst [smem:[#allocation14_spill]] %s1170_s0 }
   0x2   :  { %1180 = sst [smem:[#allocation15_spill]] %s1172_s2 }
   0x3   :  { %8 = vsyncpa [#allocation3], 0 }
   0x4   :  { %10 = vsyncpa [#allocation3 + $0x1], 0 }
   0x5   :  { %11 = vsyncpa [#allocation6], 0 }
   0x6   :  { %13 = vsyncpa [#allocation6 + $0x1], 0 }
   0x7   :  { %14 = vsyncpa [#allocation4], 0 }
   0x8   :  { %16 = vsyncpa [#allocation4 + $0x1], 0  ;;  %s901_s12 = smov 0   ;;  %s903_s13 = smov 0  }
   0x9   :  { %s905_s14 = smov 0   ;;  %s907_s15 = smov 0  }
   0xa   :  { %s909_s16 = smov 0   ;;  %s911_s17 = smov 0  }
   0xb LB: > { %s932_s18 = sadd.s32 4294967295, %s869_s17   ;;  %s585_s19 = sadd.s32 4294967294, %s869_s17   ;;  %s869_s17 = sphi %s911_s17, %s22_s17   ;;  %s865_s16 = sphi %s909_s16, %s1204_s16   ;;  %s861_s15 = sphi %s907_s15, %s1203_s15   ;;  %s857_s14 = sphi %s905_s14, %s1202_s14   ;;  %s853_s13 = sphi %s903_s13, %s1201_s13   ;;  %s849_s12 = sphi %s901_s12, %s1200_s12  }
   0xc   : > { %s43_s20 = sadd.s32 1, %s857_s14  ;;  %p50_p0 = scmp.ne.s32.totalorder %s857_s14, %s853_s13 }
   0xd   : > { %p56_p1 = scmp.ne.s32.totalorder %s853_s13, %s849_s12  ;;  %p1174_p2 = scmp.eq.s32.totalorder %s932_s18, 0 }
   0xe   : > { %p131_p3 = scmp.eq.s32.totalorder %s932_s18, 1  ;;  %p137_p4 = scmp.eq.s32.totalorder %s585_s19, 1 }
   0xf   : > { %p944_p5 = por %p1174_p2, %p56_p1  ;;  %p586_p6 = scmp.ge.s32.totalorder %s869_s17, 1 }
  0x10   : > { %p952_p7 = por %p131_p3, %p50_p0  ;;  %p956_p8 = por %p137_p4, %p56_p1 }
  0x11   : > { %s1181_s21 = scalar_select %p944_p5, 1, 0 }
  0x12   : > { %s1182_s22 = scalar_select %p952_p7, 1, 0 }
  0x13   : > { %s1183_s23 = scalar_select %p956_p8, 1, 0 }
  0x14   : > { %p144_p9 = scmp.lt.s32.totalorder %s869_s17, 3  ;;  %s871_s25 = smov [#allocation7]  }
  0x15   : > { %s157_s26 = sshll.u32 %s871_s25, 4  ;;  %s34_s27 = sadd.s32 1, %s865_s16  ;;  %s158_s26 = int_to_ptr.vmem [resolvable:$true] %s157_s26 }
  0x16   : > { %p962_p11 = pnand %p586_p6, %p144_p9  ;;  %p51_p13 = scmp.eq.s32.totalorder %s869_s17, 0 }
  0x17   : > { %p976_p1 = scmp.ge.s32.totalorder %s34_s27, 2  ;;  %p630_p6 = scmp.lt.s32.totalorder %s869_s17, 2 }
  0x18   : > { %s1184_s24 = scalar_select %p962_p11, 1, 0 }
  0x19   : > { %p614_p12 = pneg %p962_p11  ;;  %p983_p4 = por %p51_p13, %p50_p0 }
  0x1a   : > { %s989_s4 = sand.u32 1, %s857_s14   ;;  %s710_s5 = scalar_lea.vmem %s158_s26, 64 }
  0x1b   : > { %p972_p3 = pnand %p614_p12, %p1174_p2  ;;  %p711_p12 = scmp.ne.s32.totalorder %s158_s26, %s710_s5 }
  0x1c   : > { %p718_p8 = scmp.lt.s32.totalorder %s158_s26, %s158_s26  ;;  %p719_p7 = scmp.lt.s32.totalorder %s710_s5, %s710_s5 }
  0x1d   : > { %p701_p9 = pneg %p972_p3 }
  0x1e   : > { %p720_p5 = por %p719_p7, %p718_p8 }
  0x1f   : > { %p713_p10 = pnand %p711_p12, %p701_p9 }
  0x21   : > { %p714_p2 = pneg %p713_p10 }
  0x23   : > { %p721_p11 = pnand %p720_p5, %p714_p2 }
  0x25   : > { %724 = shalt.err (!%p721_p11)
}
  0x26   : > { %s1188_s2 = sld [smem:[#allocation15_spill]]  ;;  %s1206_s27 = smov (%p976_p1, %s34_s27), 0 }
  0x27   : > { %1189 = sst [smem:[#allocation13_spill]] %s1206_s27  ;;  %s589_s8 = sshll.u32 %s989_s4, 3 }
  0x28   : > { %s38_s9 = ssub.s32 %s865_s16, %s1206_s27  ;;  %s602_s10 = sshll.u32 %s865_s16, 7 }
  0x29   : > { %p41_p0 = scmp.eq.s32.totalorder %s38_s9, 0  ;;  %s1190_s0 = sld [smem:[#allocation14_spill]] }
  0x2a   : > { %s172_s28 = scalar_lea.vmem [#allocation2], %s589_s8  ;;  %p1018_p2 = pnand %p630_p6, %p983_p4 }
  0x2b   : > { %s182_s5 = sshll.u32 %s172_s28, 4  ;;  %s189_s29 = sand.u32 1, %s869_s17   ;;  %s183_s5 = int_to_ptr.vmem [resolvable:$true] %s182_s5 }
  0x2c   : > { %617 = dma.hbm_to_vmem [thread:$0]  (!%p972_p3), %s1188_s2, 64, %s158_s26, [#allocation6]  }
  0x2d   : > { %s1012_s6 = scalar_select %p41_p0, %s857_s14, %s43_s20  }
  0x2e   : > { %s592_s7 = sshll.u32 %s989_s4, 1  ;;  %s169_s9 = scalar_lea.sflag [#allocation3], %s989_s4 }
  0x2f   : > { %s180_s25 = scalar_lea.hbm %s1190_s0, %s602_s10  ;;  %p727_p5 = pneg %p1018_p2 }
  0x30   : > { %s738_s10 = scalar_lea.vmem %s183_s5, 128  ;;  %s872_s20 = smov [#allocation2]  }
  0x31   : > { %p739_p7 = scmp.ne.s32.totalorder %s183_s5, %s738_s10  ;;  %s743_s30 = sshll.u32 %s872_s20, 4  ;;  %s744_s30 = int_to_ptr.vmem [resolvable:$false] %s743_s30 }
  0x32   : > { %s745_s8 = scalar_lea.vmem %s744_s30, 256  ;;  %p746_p11 = scmp.lt.s32.totalorder %s183_s5, %s744_s30 }
  0x33   : > { %p741_p8 = pnand %p739_p7, %p727_p5  ;;  %p747_p13 = scmp.lt.s32.totalorder %s745_s8, %s738_s10 }
  0x35   : > { %p742_p10 = pneg %p741_p8  ;;  %p748_p3 = por %p747_p13, %p746_p11 }
  0x37   : > { %p749_p1 = pnand %p748_p3, %p742_p10 }
  0x39   : > { %752 = shalt.err (!%p749_p1)
}
  0x3a   : > { %621 = dma.hbm_to_vmem [thread:$0]  (!%p1018_p2), %s180_s25, 128, %s183_s5, %s169_s9  }
  0x3b   : > { %s603_s4 = sshll.u32 %s865_s16, 5  ;;  %s193_s0 = scalar_lea.vmem [#allocation5], %s592_s7 }
  0x3c   : > { %s201_s28 = scalar_lea.hbm %s1171_s1, %s603_s4  ;;  %s203_s2 = sshll.u32 %s193_s0, 4  ;;  %s204_s2 = int_to_ptr.vmem [resolvable:$true] %s203_s2 }
  0x3d   : > { %s190_s20 = scalar_lea.sflag [#allocation6], %s189_s29  ;;  %s766_s27 = scalar_lea.vmem %s204_s2, 32 }
  0x3e   : > { %p767_p4 = scmp.ne.s32.totalorder %s204_s2, %s766_s27  ;;  %s873_s10 = smov [#allocation5]  }
  0x3f   : > { %s771_s30 = sshll.u32 %s873_s10, 4  ;;  %s772_s30 = int_to_ptr.vmem [resolvable:$false] %s771_s30 }
  0x40   : > { %p769_p6 = pnand %p767_p4, %p727_p5  ;;  %s773_s8 = scalar_lea.vmem %s772_s30, 64 }
  0x41   : > { %p774_p12 = scmp.lt.s32.totalorder %s204_s2, %s772_s30  ;;  %p775_p0 = scmp.lt.s32.totalorder %s773_s8, %s766_s27 }
  0x42   : > { %p770_p9 = pneg %p769_p6 }
  0x43   : > { %p776_p7 = por %p775_p0, %p774_p12 }
  0x45   : > { %p777_p8 = pnand %p776_p7, %p770_p9 }
  0x47   : > { %780 = shalt.err (!%p777_p8)
}
  0x48   : > { %624 = dma.hbm_to_vmem [thread:$0]  (!%p1018_p2), %s201_s28, 32, %s204_s2, %s190_s20  }
  0x49   : > { %p1192_p10 = scmp.ne.s32.totalorder %s1184_s24, 0 }
  0x4a   : > { %s1044_s0 = sand.u32 (!%p1192_p10), 1, %s853_s13   ;;  %p1193_p5 = scmp.ne.s32.totalorder (!%p1192_p10), %s1181_s21, 0 }
  0x4b   : > { %212 = sbr.rel (%p1192_p10) target bundleno = 299 (0x12b), region = 32  ;;  %s596_s25 = sshll.u32 (!%p1192_p10), %s1044_s0, 3 }
  0x4c   : > { %s215_s5 = scalar_lea.sflag (!%p1192_p10), [#allocation3], %s1044_s0  ;;  %s1048_s29 = scalar_lea.vmem (!%p1192_p10), [#allocation2], %s596_s25 }
  0x50   : > { %832 = dma.done.wait (%p1193_p5), %s215_s5, 128  }
  0x51   : > { %834 = vsyncadd (%p1193_p5), %s215_s5, 4294967168  ;;  %s223_s2 = sand.u32 1, %s932_s18   ;;  %s597_s24 = sshll.u32 %s1044_s0, 1 }
  0x52   : > { %s224_s27 = scalar_lea.sflag [#allocation6], %s223_s2  ;;  %s227_s26 = scalar_lea.vmem [#allocation5], %s597_s24 }
  0x53   : > { %836 = dma.done.wait (%p1193_p5), %s224_s27, 32  }
  0x54   : > { %838 = vsyncadd (%p1193_p5), %s224_s27, 4294967264  ;;  %p1194_p2 = scmp.eq.s32.totalorder %s932_s18, 0 }
  0x56   : > { %840 = dma.done.wait (%p1194_p2), [#allocation6], 64   ;;  %p1195_p11 = pmov %p1194_p2 }
  0x57   : > { %v874_v0 = vmov 0   ;;  %v875_v1 = vmov 2   ;;  %v262_v2 = vlaneseq  ;;  %v261_v4 = vld [vmem:[#allocation7] sm:$0xf]  ;;  %v1067_v5 = vld [vmem:[%s227_s26] sm:$0x3] }
  0x58   : > { %842 = vsyncadd (%p1195_p11), [#allocation6], 4294967232  ;;  %688 = vset.pattern.permute.xlu0 %v874_v0  ;;  %690 = vset.pattern.permute.xlu1 %v875_v1  ;;  %vm438_vm0 = vcmp.ne.s32.totalorder %v1067_v5, 255  ;;  %v876_v11 = vmov 1   ;;  %v877_v12 = vmov 3   ;;  %v878_v13 = vmov 4  }
  0x59   : > { %v1065_v3 = vshrl.u32 %v262_v2, 7  ;;  %356 = vperm.xlu0 %688, %v261_v4   ;;  %387 = vperm.xlu1 %690, %v261_v4   ;;  %v439_v8 = vsel %vm438_vm0, 1, %v874_v0  ;;  %v879_v14 = vmov 5   ;;  %v1082_v15 = vld [vmem:[%s1048_s29] sm:$0xff]  ;;  %vm273_vm1 = vcmask 1043456   ;;  %s599_s18 = sshll.u32 %s861_s15, 4 }
  0x5a   : > { %v271_v16 = vcombine.high %v1082_v15, %v1082_v15  ;;  %v274_v17 = vsel %vm273_vm1, %v1082_v15, -inf  ;;  %s257_s21 = scalar_lea.vmem [#allocation8], %s1044_s0  ;;  %s469_s11 = scalar_lea.hbm %s1173_s3, %s599_s18 }
  0x5b   : > { %v346_v6 = vsub.s32 0, %v1065_v3  ;;  %v350_v7 = vsub.s32 1, %v1065_v3  ;;  %v275_v19 = vrot.slane %v274_v17, 4  ;;  %s471_s7 = sshll.u32 %s257_s21, 4  ;;  %s458_s19 = scalar_lea.sflag [#allocation4], %s1044_s0  ;;  %s472_s7 = int_to_ptr.vmem [resolvable:$true] %s471_s7 }
  0x5c   : > { %v281_v18 = vsel %vm273_vm1, %v271_v16, -inf  ;;  %s781_s28 = scalar_lea.vmem %s472_s7, 16  ;;  %p1196_p3 = scmp.ne.s32.totalorder %s1182_s22, 0 }
  0x5d   : > { %v1075_v9 = vrot.slane %v439_v8, %v346_v6  ;;  %v1079_v10 = vrot.slane %v439_v8, %v350_v7  ;;  %689 = vset.pattern.permute.xlu0 %v876_v11  ;;  %691 = vset.pattern.permute.xlu1 %v877_v12  ;;  %v282_v20 = vrot.slane %v281_v18, 4  ;;  %v276_v21 = vmax.f32 %v274_v17, %v275_v19  ;;  %p782_p13 = scmp.ne.s32.totalorder %s472_s7, %s781_s28  ;;  %s880_s20 = smov [#allocation8]  }
  0x5e   : > { %360 = vperm.xlu0 %689, %v261_v4   ;;  %391 = vperm.xlu1 %691, %v261_v4   ;;  %v347_v11 = vrot.slane %v1067_v5, %v346_v6  ;;  %v351_v12 = vrot.slane %v1067_v5, %v350_v7  ;;  %s785_s10 = sshll.u32 %s880_s20, 4  ;;  %s786_s10 = int_to_ptr.vmem [resolvable:$false] %s785_s10 }
  0x5f   : > { %v283_v22 = vmax.f32 %v281_v18, %v282_v20  ;;  %v277_v23 = vrot.slane %v276_v21, 2  ;;  %vm448_vm10 = vcmp.ne.s32.totalorder %v1075_v9, 0  ;;  %vm449_vm11 = vcmp.ne.s32.totalorder %v1079_v10, 0  ;;  %p783_p1 = pnand %p782_p13, %p1196_p3  ;;  %s787_s15 = scalar_lea.vmem %s786_s10, 32 }
  0x60   : > { %vm352_vm7 = vcmp.eq.s32.totalorder %v1065_v3, %v347_v11  ;;  %vm353_vm8 = vcmp.eq.s32.totalorder %v1065_v3, %v351_v12  ;;  %p788_p6 = scmp.lt.s32.totalorder %s472_s7, %s786_s10  ;;  %p789_p9 = scmp.lt.s32.totalorder %s787_s15, %s781_s28 }
  0x61   : > { %v284_v24 = vrot.slane %v283_v22, 2  ;;  %v278_v25 = vmax.f32 %v276_v21, %v277_v23  ;;  %p784_p4 = pneg %p783_p1 }
  0x62   : > { %692 = vset.pattern.permute.xlu1 %v878_v13  ;;  %693 = vset.pattern.permute.xlu0 %v879_v14  ;;  %p790_p12 = por %p789_p9, %p788_p6 }
  0x63   : > { %402 = vperm.xlu1 %692, %v261_v4   ;;  %406 = vperm.xlu0 %693, %v261_v4   ;;  %v285_v26 = vmax.f32 %v283_v22, %v284_v24  ;;  %v279_v27 = vrot.slane %v278_v25, 1 }
  0x64   : > { %p791_p0 = pnand %p790_p12, %p784_p4 }
  0x65   : > { %v286_v28 = vrot.slane %v285_v26, 1  ;;  %v280_v29 = vmax.f32 %v278_v25, %v279_v27 }
  0x67   : > { %v287_v30 = vmax.f32 %v285_v26, %v286_v28 }
  0x69   : > { %v290_v31 = vcombine.low %v280_v29, %v287_v30 }
  0x6b   : > { %vm292_vm2 = vcmp.eq.f32.partialorder %v1082_v15, %v290_v31 }
  0x6c   : > { %v293_v32 = vsel %vm292_vm2, 1, %v874_v0  ;;  %v309_v38 = vsel %vm292_vm2, -inf, %v1082_v15 }
  0x6d   : > { %v294_v33 = vcombine.high %v293_v32, %v293_v32  ;;  %v295_v34 = vsel %vm273_vm1, %v293_v32, 0  ;;  %v311_v41 = vcombine.high %v309_v38, %v309_v38  ;;  %v313_v44 = vsel %vm273_vm1, %v309_v38, -inf }
  0x6e   : > { %v296_v36 = vrot.slane %v295_v34, 4  ;;  %v314_v48 = vrot.slane %v313_v44, 4 }
  0x6f   : > { %v302_v35 = vsel %vm273_vm1, %v294_v33, 0  ;;  %v320_v45 = vsel %vm273_vm1, %v311_v41, -inf }
  0x70   : > { %v303_v37 = vrot.slane %v302_v35, 4  ;;  %v297_v39 = vadd.s32 %v296_v36, %v295_v34  ;;  %v321_v49 = vrot.slane %v320_v45, 4  ;;  %v315_v52 = vmax.f32 %v313_v44, %v314_v48 }
  0x72   : > { %v304_v40 = vadd.s32 %v303_v37, %v302_v35  ;;  %v298_v42 = vrot.slane %v297_v39, 2  ;;  %v322_v53 = vmax.f32 %v320_v45, %v321_v49  ;;  %v316_v56 = vrot.slane %v315_v52, 2 }
  0x74   : > { %v305_v43 = vrot.slane %v304_v40, 2  ;;  %v299_v46 = vadd.s32 %v298_v42, %v297_v39  ;;  %v323_v57 = vrot.slane %v322_v53, 2  ;;  %v317_v58 = vmax.f32 %v315_v52, %v316_v56 }
  0x76   : > { %v306_v47 = vadd.s32 %v305_v43, %v304_v40  ;;  %v300_v50 = vrot.slane %v299_v46, 1  ;;  %v324_v59 = vmax.f32 %v322_v53, %v323_v57  ;;  %v318_v62 = vrot.slane %v317_v58, 1 }
  0x78   : > { %v307_v51 = vrot.slane %v306_v47, 1  ;;  %v301_v54 = vadd.s32 %v300_v50, %v299_v46  ;;  %v325_v63 = vrot.slane %v324_v59, 1  ;;  %v319_v2 = vmax.f32 %v317_v58, %v318_v62 }
  0x7a   : > { %v308_v55 = vadd.s32 %v307_v51, %v306_v47  ;;  %vm327_vm3 = vcmp.eq.s32.totalorder %v301_v54, 1  ;;  %v326_v4 = vmax.f32 %v324_v59, %v325_v63 }
  0x7b   : > { %v333_v60 = vsel %vm327_vm3, 1, %v874_v0 }
  0x7c   : > { %vm328_vm4 = vcmp.eq.s32.totalorder %v308_v55, 1  ;;  %v340_v8 = vcombine.low %v319_v2, %v326_v4 }
  0x7d   : > { %v334_v61 = vsel %vm328_vm4, 1, %v874_v0 }
  0x7e   : > { %v335_v1 = vcombine.low %v333_v60, %v334_v61 }
  0x80   : > { %vm336_vm5 = vcmp.ne.s32.totalorder %v335_v1, 0 }
  0x81   : > { %vm337_vm6 = vmand %vm292_vm2, %vm336_vm5 }
  0x82   : > { %v342_v0 = vsel %vm337_vm6, %v340_v8, %v290_v31 }
  0x83   : > { %v343_v14 = vsub.f32 %v1082_v15, %v342_v0 }
  0xd4   : > { %v357_v13 = vpop.permute.xlu0 %356  ;;  %v388_v23 = vpop.permute.xlu1 %387 }
  0xd9   : > { %v361_v16 = vpop.permute.xlu0 %360  ;;  %v392_v25 = vpop.permute.xlu1 %391 }
  0xda   : > { %v363_v17 = vsel %vm352_vm7, %v357_v13, %v361_v16  ;;  %v364_v18 = vsel %vm353_vm8, %v357_v13, %v361_v16  ;;  %v394_v34 = vsel %vm352_vm7, %v388_v23, %v392_v25  ;;  %v395_v39 = vsel %vm353_vm8, %v388_v23, %v392_v25 }
  0xdb   : > { %v367_v6 = vcombine.low %v363_v17, %v364_v18 }
  0xdd   : > { %v369_v19 = vsub.f32 %v343_v14, %v367_v6 }
  0xde   : > { %v403_v29 = vpop.permute.xlu1 %402  ;;  %v407_v30 = vpop.permute.xlu0 %406 }
  0xdf   : > { %v372_v20 = vand.u32 2147483647, %v369_v19  ;;  %v370_v26 = vsub.f32 0.0, %v369_v19  ;;  %v409_v36 = vsel %vm352_vm7, %v403_v29, %v407_v30  ;;  %v397_v37 = vcombine.high %v369_v19, %v369_v19 }
  0xe0   : > { %v410_v40 = vsel %vm353_vm8, %v403_v29, %v407_v30  ;;  %v399_v41 = vmul.f32 %v394_v34, %v369_v19 }
  0xe1   : > { %v373_v21 = vsub.f32 0.0, %v372_v20  ;;  %v371_v33 = vmax.f32 %v370_v26, 0.0  ;;  %v400_v44 = vmul.f32 %v397_v37, %v395_v39 }
  0xe3   : > { %v374_v5 = vmul.f32 1.442695, %v373_v21 }
  0xe5   : > { %695 = vpow2.f32 %v374_v5 }
  0xf2   : > { %v696_v7 = vpop.eup %695 }
  0xf3   : > { %v376_v22 = vadd.f32 1.0, %v696_v7  ;;  %v379_v24 = vmul.f32 -0.5, %v696_v7  ;;  %v382_v27 = vand.u32 2147483647, %v696_v7 }
  0xf5   : > { %697 = vlog2.f32 %v376_v22  ;;  %v380_v15 = vadd.f32 1.0, %v379_v24  ;;  %vm383_vm9 = vcmp.lt.f32.partialorder %v382_v27, 0.0004427343 }
  0xf7   : > { %v381_v32 = vmul.f32 %v696_v7, %v380_v15 }
 0x102   : > { %v698_v28 = vpop.eup %697 }
 0x103   : > { %v378_v31 = vmul.f32 0.6931472, %v698_v28 }
 0x105   : > { %v384_v35 = vsel %vm383_vm9, %v381_v32, %v378_v31 }
 0x106   : > { %v385_v38 = vadd.f32 %v384_v35, %v371_v33 }
 0x108   : > { %v412_v42 = vcombine.high %v385_v38, %v385_v38  ;;  %v414_v43 = vmul.f32 %v409_v36, %v385_v38 }
 0x10a   : > { %v415_v45 = vmul.f32 %v412_v42, %v410_v40  ;;  %v416_v46 = vadd.f32 %v414_v43, %v399_v41 }
 0x10c   : > { %v417_v47 = vadd.f32 %v415_v45, %v400_v44  ;;  %v418_v48 = vsel %vm273_vm1, %v416_v46, 0.0 }
 0x10d   : > { %v419_v49 = vrot.slane %v418_v48, 4 }
 0x10e   : > { %v425_v50 = vsel %vm273_vm1, %v417_v47, 0.0 }
 0x10f   : > { %v420_v51 = vadd.f32 %v419_v49, %v418_v48  ;;  %v426_v52 = vrot.slane %v425_v50, 4 }
 0x111   : > { %v421_v53 = vrot.slane %v420_v51, 2  ;;  %v427_v54 = vadd.f32 %v426_v52, %v425_v50 }
 0x113   : > { %v422_v3 = vadd.f32 %v421_v53, %v420_v51  ;;  %v428_v55 = vrot.slane %v427_v54, 2 }
 0x115   : > { %v423_v56 = vrot.slane %v422_v3, 1  ;;  %v429_v57 = vadd.f32 %v428_v55, %v427_v54 }
 0x117   : > { %v424_v58 = vadd.f32 %v423_v56, %v422_v3  ;;  %v430_v59 = vrot.slane %v429_v57, 1 }
 0x119   : > { %v431_v60 = vadd.f32 %v430_v59, %v429_v57  ;;  %v452_v61 = vsel %vm448_vm10, %v424_v58, 0.0 }
 0x11b   : > { %v453_v62 = vsel %vm449_vm11, %v431_v60, 0.0 }
 0x11c   : > { %v454_v63 = vadd.f32 %v453_v62, %v452_v61 }
 0x11e   : > { %456 = vst [vmem:[%s257_s21] sm:$0x1] %v454_v63 }
 0x11f   : > { %794 = shalt.err (!%p791_p0)
}
 0x120   : > { %s795_s30 = scalar_lea.hbm %s469_s11, 16  ;;  %s799_s25 = scalar_lea.hbm %s1173_s3, 32 }
 0x121   : > { %p796_p7 = scmp.ne.s32.totalorder %s469_s11, %s795_s30  ;;  %p800_p5 = scmp.lt.s32.totalorder %s469_s11, %s1173_s3 }
 0x122   : > { %p801_p2 = scmp.lt.s32.totalorder %s799_s25, %s795_s30 }
 0x123   : > { %p797_p8 = pnand %p796_p7, %p1196_p3 }
 0x124   : > { %p802_p11 = por %p801_p2, %p800_p5 }
 0x125   : > { %p798_p10 = pneg %p797_p8 }
 0x127   : > { %p803_p13 = pnand %p802_p11, %p798_p10 }
 0x129   : > { %806 = shalt.err (!%p803_p13)
}
 0x12a   : > { %612 = dma.vmem_to_hbm [thread:$0]  (%p1196_p3), %s472_s7, 16, %s469_s11, %s458_s19  }
 0x12b PF: > { %s483_s2 = sand.u32 1, %s849_s12   ;;  %p1197_p1 = scmp.ne.s32.totalorder %s1183_s23, 0 }
 0x12c   : > { %p1198_p4 = scmp.ge.s32.totalorder %s869_s17, 2  ;;  %s484_s24 = scalar_lea.sflag [#allocation4], %s483_s2 }
 0x12e   : > { %p626_p6 = pnand %p1198_p4, %p1197_p1 }
 0x130   : > { %p627_p9 = pneg %p626_p6 }
 0x132   : > { %844 = dma.done.wait (%p627_p9), %s484_s24, 16  }
 0x133   : > { %846 = vsyncadd (%p627_p9), %s484_s24, 4294967280  ;;  %s22_s17 = sadd.s32 1, %s869_s17   ;;  %s1199_s22 = sld [smem:[#allocation13_spill]] }
 0x134   : > { %p19_p12 = scmp.ge.s32.totalorder %s22_s17, 4   ;;  %s1200_s12 = smov %s853_s13 }
 0x135   : > { %s1201_s13 = smov %s857_s14  ;;  %s1202_s14 = smov %s1012_s6 }
 0x136   : > { %s1203_s15 = smov %s865_s16  ;;  %21 = sbr.rel (!%p19_p12) target bundleno = 11 (0xb), region = 94 }
 0x139   : > { %s1204_s16 = smov %s1199_s22 }
 0x13b   :  { %488 = vsyncpa [#allocation3], 1 }
 0x13c   :  { %490 = vsyncpa [#allocation3 + $0x1], 1 }
 0x13d   :  { %491 = vsyncpa [#allocation6], 1 }
 0x13e   :  { %493 = vsyncpa [#allocation6 + $0x1], 1 }
 0x13f   :  { %494 = vsyncpa [#allocation4], 1 }
 0x140   :  { %496 = vsyncpa [#allocation4 + $0x1], 1 }

</bundles_post_ra>
